<compile_context>
chip_gen: v5e
topology: v5e:2x2
jax: 0.10.0
libtpu: 0.0.40
codegen_flags: <defaults>
</compile_context>

<pallas_src>
import jax
import jax.numpy as jnp
from jax.experimental import pallas as pl
from jax.experimental.pallas import tpu as pltpu

LANES = 512  # lane-axis width of the batch slab (multiple of 128)


def mlp_kernel(p_ref, x_ref, o_ref):
    # p_ref (SMEM, f32[9]): [w1_00, w1_01, w1_10, w1_11, b1_0, b1_1, w2_0, w2_1, b2]
    #   w1 stored (in, out), w2 stored (in, 1)  (== PyTorch's x @ W.T convention).
    # x_ref (VMEM): (2, tr, LANES)  -- feature index leading, batch dense on (sublane, lane).
    # o_ref (VMEM): (tr, LANES)     -- (8,128)-dense output slab.
    x0 = x_ref[0]                          # (tr, LANES)
    x1 = x_ref[1]                          # (tr, LANES)

    w1_00 = p_ref[0]
    w1_01 = p_ref[1]
    w1_10 = p_ref[2]
    w1_11 = p_ref[3]
    b1_0 = p_ref[4]
    b1_1 = p_ref[5]
    w2_0 = p_ref[6]
    w2_1 = p_ref[7]
    b2_0 = p_ref[8]

    # fc1 + ReLU  (pure VPU broadcast FMAs, no MXU)
    h0 = jnp.maximum(x0 * w1_00 + x1 * w1_10 + b1_0, 0.0)
    h1 = jnp.maximum(x0 * w1_01 + x1 * w1_11 + b1_1, 0.0)

    # fc2 + sigmoid via tanh: one EUP op, overflow-free.
    y = h0 * w2_0 + h1 * w2_1 + b2_0
    o_ref[...] = 0.5 * jnp.tanh(0.5 * y) + 0.5


def _tile_rows(rows, lanes):
    """Pick the sublane-tile size tr (multiple of 8) and number of grid tiles."""
    # Per-generation VMEM budget: double-buffered working set is ~24 B / element
    # (input 2*f32 x2 buffers + output f32 x2 buffers).  Keep it to ~half of VMEM.
    try:
        vmem_cap = int(pltpu.get_tpu_info().vmem_capacity_bytes)
    except Exception:
        vmem_cap = 64 << 20  # conservative (v7x) fallback
    budget = vmem_cap // 2
    tr_cap = max(8, (budget // (24 * lanes)) // 8 * 8)

    if rows <= 8:
        # Tiny problem: a single full-extent block (tr == R is allowed by the tiling rules).
        return rows, 1, vmem_cap

    # Aim for >= 2 tiles so v7x's two TensorCores both get work, capped by the VMEM budget.
    half = -(-rows // 2)
    half8 = -(-half // 8) * 8
    tr = min(tr_cap, half8)
    n_tiles = pl.cdiv(rows, tr)
    return tr, n_tiles, vmem_cap


def simple_nn_forward(x, w1, b1, w2, b2):
    """x: (B, 2) f32. w1: (2,2) (in,out), b1: (1,2), w2: (2,1), b2: (1,1). Returns (B, 1)."""
    B = x.shape[0]
    L = LANES

    # Pack the 9 parameters into a single SMEM-resident scalar array.
    params = jnp.concatenate(
        [w1.reshape(-1), b1.reshape(-1), w2.reshape(-1), b2.reshape(-1)]
    ).astype(jnp.float32)

    rows = pl.cdiv(B, L)
    tr, n_tiles, vmem_cap = _tile_rows(rows, L)
    rows_p = n_tiles * tr
    Bp = rows_p * L

    # Feature-major, (sublane,lane)-dense slab: (2, rows_p, L).
    xT = x.astype(jnp.float32).T                                   # (2, B)
    xt = jnp.zeros((2, Bp), jnp.float32).at[:, :B].set(xT).reshape(2, rows_p, L)

    vmem_limit = int(min(vmem_cap, max(32 << 20, 24 * tr * L + (8 << 20))))

    out = pl.pallas_call(
        mlp_kernel,
        out_shape=jax.ShapeDtypeStruct((rows_p, L), jnp.float32),
        grid=(n_tiles,),
        in_specs=[
            pl.BlockSpec(memory_space=pltpu.MemorySpace.SMEM),     # packed params f32[9]
            pl.BlockSpec((2, tr, L), lambda i: (0, i, 0)),         # x slab tile
        ],
        out_specs=pl.BlockSpec((tr, L), lambda i: (i, 0)),         # dense output slab tile
        compiler_params=pltpu.CompilerParams(
            dimension_semantics=("parallel",),                     # shards across v7x's 2 TCs
            vmem_limit_bytes=vmem_limit,
        ),
    )(params, xt)

    # Padded tail elements are garbage-but-finite; they are discarded here.
    return out.reshape(Bp)[:B].reshape(B, 1)


def init_params(key):
    # Deterministic init mimicking nn.Linear's U(-1/sqrt(fan_in), 1/sqrt(fan_in)).
    k1, k2, k3, k4 = jax.random.split(key, 4)
    bound = 1.0 / jnp.sqrt(2.0)   # fan_in = 2 for both layers
    w1 = jax.random.uniform(k1, (2, 2), jnp.float32, -bound, bound)   # (in, out)
    b1 = jax.random.uniform(k2, (1, 2), jnp.float32, -bound, bound)
    w2 = jax.random.uniform(k3, (2, 1), jnp.float32, -bound, bound)   # (in, out)
    b2 = jax.random.uniform(k4, (1, 1), jnp.float32, -bound, bound)
    return w1, b1, w2, b2


if __name__ == "__main__":
    key = jax.random.PRNGKey(0)
    k_x, k_p = jax.random.split(key)

    B = 8
    x = jax.random.normal(k_x, (B, 2), dtype=jnp.float32)
    w1, b1, w2, b2 = init_params(k_p)

    out = jax.block_until_ready(simple_nn_forward(x, w1, b1, w2, b2))

    # Reference check in plain JAX (same math as the PyTorch forward).
    h_ref = jnp.maximum(x @ w1 + b1, 0.0)
    y_ref = jax.nn.sigmoid(h_ref @ w2 + b2)
    assert out.shape == (B, 1)
    assert jnp.allclose(out, y_ref, atol=1e-3, rtol=1e-3)

    print("KERNEL_OK")
</pallas_src>

<mosaic_0001>
module attributes {stable_mosaic.version = 11 : i64} {
  func.func @mlp_kernel(%arg0: i32, %arg1: memref<9xf32, #tpu.memory_space<smem>>, %arg2: memref<2x1x512xf32, #tpu.memory_space<vmem>>, %arg3: memref<1x512xf32, #tpu.memory_space<vmem>>) attributes {dimension_semantics = [#tpu.dimension_semantics<parallel>], iteration_bounds = array<i64: 1>, scalar_prefetch = 0 : i64, scratch_operands = 0 : i64, tpu.core_type = #tpu.core_type<tc>, window_params = [{transform_indices = @transform_0, window_bounds = array<i64: 9>}, {transform_indices = @transform_1, window_bounds = array<i64: 2, 1, 512>}, {transform_indices = @transform_2, window_bounds = array<i64: 1, 512>}]} {
    %c0 = arith.constant 0 : index
    %c0_0 = arith.constant 0 : index
    %c0_1 = arith.constant 0 : index
    %0 = vector.load %arg2[%c0, %c0_0, %c0_1] : memref<2x1x512xf32, #tpu.memory_space<vmem>>, vector<1x1x512xf32>
    %1 = vector.shape_cast %0 : vector<1x1x512xf32> to vector<1x512xf32>
    %c1 = arith.constant 1 : index
    %c0_2 = arith.constant 0 : index
    %c0_3 = arith.constant 0 : index
    %2 = vector.load %arg2[%c1, %c0_2, %c0_3] : memref<2x1x512xf32, #tpu.memory_space<vmem>>, vector<1x1x512xf32>
    %3 = vector.shape_cast %2 : vector<1x1x512xf32> to vector<1x512xf32>
    %c0_4 = arith.constant 0 : index
    %4 = memref.load %arg1[%c0_4] : memref<9xf32, #tpu.memory_space<smem>>
    %c1_5 = arith.constant 1 : index
    %5 = memref.load %arg1[%c1_5] : memref<9xf32, #tpu.memory_space<smem>>
    %c2 = arith.constant 2 : index
    %6 = memref.load %arg1[%c2] : memref<9xf32, #tpu.memory_space<smem>>
    %c3 = arith.constant 3 : index
    %7 = memref.load %arg1[%c3] : memref<9xf32, #tpu.memory_space<smem>>
    %c4 = arith.constant 4 : index
    %8 = memref.load %arg1[%c4] : memref<9xf32, #tpu.memory_space<smem>>
    %c5 = arith.constant 5 : index
    %9 = memref.load %arg1[%c5] : memref<9xf32, #tpu.memory_space<smem>>
    %c6 = arith.constant 6 : index
    %10 = memref.load %arg1[%c6] : memref<9xf32, #tpu.memory_space<smem>>
    %c7 = arith.constant 7 : index
    %11 = memref.load %arg1[%c7] : memref<9xf32, #tpu.memory_space<smem>>
    %c8 = arith.constant 8 : index
    %12 = memref.load %arg1[%c8] : memref<9xf32, #tpu.memory_space<smem>>
    %13 = vector.broadcast %4 : f32 to vector<1x512xf32>
    %14 = arith.mulf %1, %13 : vector<1x512xf32>
    %15 = vector.broadcast %6 : f32 to vector<1x512xf32>
    %16 = arith.mulf %3, %15 : vector<1x512xf32>
    %17 = arith.addf %14, %16 : vector<1x512xf32>
    %18 = vector.broadcast %8 : f32 to vector<1x512xf32>
    %19 = arith.addf %17, %18 : vector<1x512xf32>
    %cst = arith.constant 0.000000e+00 : f32
    %20 = vector.broadcast %cst : f32 to vector<1x512xf32>
    %21 = arith.maximumf %19, %20 : vector<1x512xf32>
    %22 = vector.broadcast %5 : f32 to vector<1x512xf32>
    %23 = arith.mulf %1, %22 : vector<1x512xf32>
    %24 = vector.broadcast %7 : f32 to vector<1x512xf32>
    %25 = arith.mulf %3, %24 : vector<1x512xf32>
    %26 = arith.addf %23, %25 : vector<1x512xf32>
    %27 = vector.broadcast %9 : f32 to vector<1x512xf32>
    %28 = arith.addf %26, %27 : vector<1x512xf32>
    %cst_6 = arith.constant 0.000000e+00 : f32
    %29 = vector.broadcast %cst_6 : f32 to vector<1x512xf32>
    %30 = arith.maximumf %28, %29 : vector<1x512xf32>
    %31 = vector.broadcast %10 : f32 to vector<1x512xf32>
    %32 = arith.mulf %21, %31 : vector<1x512xf32>
    %33 = vector.broadcast %11 : f32 to vector<1x512xf32>
    %34 = arith.mulf %30, %33 : vector<1x512xf32>
    %35 = arith.addf %32, %34 : vector<1x512xf32>
    %36 = vector.broadcast %12 : f32 to vector<1x512xf32>
    %37 = arith.addf %35, %36 : vector<1x512xf32>
    %cst_7 = arith.constant 5.000000e-01 : f32
    %38 = vector.broadcast %cst_7 : f32 to vector<1x512xf32>
    %39 = arith.mulf %38, %37 : vector<1x512xf32>
    %40 = math.tanh %39 : vector<1x512xf32>
    %cst_8 = arith.constant 5.000000e-01 : f32
    %41 = vector.broadcast %cst_8 : f32 to vector<1x512xf32>
    %42 = arith.mulf %41, %40 : vector<1x512xf32>
    %cst_9 = arith.constant 5.000000e-01 : f32
    %43 = vector.broadcast %cst_9 : f32 to vector<1x512xf32>
    %44 = arith.addf %42, %43 : vector<1x512xf32>
    %c0_10 = arith.constant 0 : index
    %c0_11 = arith.constant 0 : index
    %45 = vector.load %arg3[%c0_10, %c0_11] : memref<1x512xf32, #tpu.memory_space<vmem>>, vector<1x512xf32>
    tpu.vector_store %arg3[%c0_10, %c0_11], %44 {strides = array<i32>} : memref<1x512xf32, #tpu.memory_space<vmem>>, vector<1x512xf32>,
    return
  }
  func.func @transform_0(%arg0: i32) -> i32 {
    %c0_i32 = arith.constant 0 : i32
    %c0_i32_0 = arith.constant 0 : i32
    return %c0_i32 : i32
  }
  func.func @transform_1(%arg0: i32) -> (i32, i32, i32) {
    %c0_i32 = arith.constant 0 : i32
    %c0_i32_0 = arith.constant 0 : i32
    %c0_i32_1 = arith.constant 0 : i32
    return %c0_i32, %arg0, %c0_i32_0 : i32, i32, i32
  }
  func.func @transform_2(%arg0: i32) -> (i32, i32) {
    %c0_i32 = arith.constant 0 : i32
    %c0_i32_0 = arith.constant 0 : i32
    return %arg0, %c0_i32 : i32, i32
  }
}

</mosaic_0001>

<bundles_post_ra>
// kernel: tpu_custom_call.1
= control target key start
LH: loop header
LB: loop body
LE: loop exit
PB: predicated region body
PF: predicated region fallthrough
CT: control target
= control target key end

     0   :  { %7 = vsyncpa [#allocation5], 0  ;;  %s213_s0 = inlined_call_operand.hbm [shape: f32[9], index: 0, kind: input, shape index: {}]   ;;  %s214_s1 = inlined_call_operand.hbm [shape: f32[2,1,512], index: 1, kind: input, shape index: {}]   ;;  %s215_s2 = inlined_call_operand.hbm [shape: f32[1,512], index: 2, kind: output, shape index: {}]  }
   0x1   :  { %8 = vsyncpa [#allocation3], 0 }
   0x2   :  { %9 = vsyncpa [#allocation4], 0  ;;  %s15_s11 = sshll.u32 %s213_s0, 4  ;;  %s23_s14 = sshll.u32 %s214_s1, 4  ;;  %s16_s11 = int_to_ptr.hbm [resolvable:$true] %s15_s11  ;;  %s24_s14 = int_to_ptr.hbm [resolvable:$true] %s23_s14 }
   0x3   :  { %s184_s15 = smov [#allocation2]   ;;  %s185_s16 = smov [#allocation6]  }
   0x4   :  { %18 = dma.hbm_to_smem %s16_s11, 16, %s184_s15, [#allocation5]  }
   0x5   :  { %s25_s17 = sshll.u32 %s185_s16, 4  ;;  %s186_s18 = smov 64   ;;  %s26_s17 = int_to_ptr.vmem [resolvable:$true] %s25_s17 }
   0x6   :  { %s187_s19 = smov 4  }
   0x7   :  { %31 = dma.hbm_to_vmem [thread:$0]  %s24_s14, 128, %s26_s17, [#allocation3], %s186_s18, %s186_s18, %s187_s19  }
   0x8   :  { %178 = dma.done.wait [#allocation5], 16  }
   0x9   :  { %179 = vsyncadd [#allocation5], 4294967280 }
   0xa   :  { %180 = dma.done.wait [#allocation3], 128  }
   0xb   :  { %181 = vsyncadd [#allocation3], 4294967168 }
   0xc   :  { %40 = sfence }
   0xd   :  { %s44_s0 = sld [smem:[#allocation2]]  ;;  %v41_v0 = vld [vmem:[#allocation6] sm:$0xf]  ;;  %v43_v1 = vld [vmem:[#allocation6 + $0x4] sm:$0xf]  ;;  %v80_v26 = vlaneseq  ;;  %s188_s27 = smov [#allocation7]  }
   0xe   :  { %s103_s20 = sld [smem:[#allocation2 + $0x1]]  ;;  %s90_s28 = sshll.u32 %s188_s27, 4  ;;  %s91_s28 = int_to_ptr.vmem [resolvable:$true] %s90_s28 }
   0xf   :  { %s104_s21 = sld [smem:[#allocation2 + $0x2]]  ;;  %s92_s3 = sshll.u32 %s215_s2, 4  ;;  %vm82_vm0 = vcmp.lt.s32.totalorder %v80_v26, 512  ;;  %s93_s3 = int_to_ptr.hbm [resolvable:$true] %s92_s3 }
  0x10   :  { %s105_s22 = sld [smem:[#allocation2 + $0x3]] }
  0x11   :  { %s106_s1 = sld [smem:[#allocation2 + $0x4]] }
  0x12   :  { %s107_s23 = sld [smem:[#allocation2 + $0x5]] }
  0x13   :  { %s108_s24 = sld [smem:[#allocation2 + $0x6]]  ;;  %v53_v2 = vstv %s44_s0 }
  0x14   :  { %s109_s25 = sld [smem:[#allocation2 + $0x7]]  ;;  %v54_v3 = vmul.f32 %v53_v2, %v41_v0  ;;  %v61_v4 = vstv %s103_s20 }
  0x15   :  { %v55_v5 = vstv %s104_s21  ;;  %v62_v6 = vmul.f32 %v61_v4, %v41_v0  ;;  %s110_s26 = sld [smem:[#allocation2 + $0x8]] }
  0x16   :  { %v56_v7 = vmul.f32 %v55_v5, %v43_v1  ;;  %v63_v8 = vstv %s105_s22 }
  0x17   :  { %v58_v9 = vstv %s106_s1  ;;  %v64_v10 = vmul.f32 %v63_v8, %v43_v1 }
  0x18   :  { %v57_v11 = vadd.f32 %v56_v7, %v54_v3  ;;  %v66_v12 = vstv %s107_s23 }
  0x19   :  { %v65_v13 = vadd.f32 %v64_v10, %v62_v6  ;;  %v69_v16 = vstv %s108_s24 }
  0x1a   :  { %v59_v14 = vadd.f32 %v58_v9, %v57_v11  ;;  %v71_v18 = vstv %s109_s25 }
  0x1b   :  { %v67_v15 = vadd.f32 %v66_v12, %v65_v13  ;;  %v74_v22 = vstv %s110_s26 }
  0x1c   :  { %v60_v17 = vmax.f32 %v59_v14, 0.0 }
  0x1d   :  { %v68_v19 = vmax.f32 %v67_v15, 0.0 }
  0x1e   :  { %v70_v20 = vmul.f32 %v69_v16, %v60_v17 }
  0x1f   :  { %v72_v21 = vmul.f32 %v71_v18, %v68_v19 }
  0x21   :  { %v73_v23 = vadd.f32 %v72_v21, %v70_v20 }
  0x23   :  { %v75_v24 = vadd.f32 %v74_v22, %v73_v23 }
  0x25   :  { %v76_v25 = vmul.f32 0.5, %v75_v24 }
  0x27   :  { %116 = vtanh.f32 %v76_v25 }
  0x2d   :  { %v117_v27 = vpop.eup %116 }
  0x2e   :  { %v78_v28 = vmul.f32 0.5, %v117_v27 }
  0x30   :  { %v79_v29 = vadd.f32 0.5, %v78_v28 }
  0x32   :  { %84 = vst.msk [vmem:[#allocation7] sm:$0xf] %vm82_vm0, %v79_v29 }
  0x33   :  { %95 = dma.vmem_to_hbm [thread:$0]  %s91_s28, 64, %s93_s3, [#allocation4]  }
  0x34   :  { %182 = dma.done.wait [#allocation4], 64  }
  0x35   :  { %183 = vsyncadd [#allocation4], 4294967232 }
  0x36   :  { %100 = vsyncpa [#allocation3], 1 }
  0x37   :  { %101 = vsyncpa [#allocation4], 1 }
  0x38   :  { %102 = vsyncpa [#allocation5], 1 }

</bundles_post_ra>
